<compile_context>
chip_gen: v7x
topology: tpu7x:2x2x1
jax: 0.10.0
libtpu: 0.0.40
codegen_flags: <defaults>
</compile_context>

<pallas_src>
import functools
import math

import jax
import jax.numpy as jnp
from jax import lax
from jax.experimental import pallas as pl
from jax.experimental.pallas import tpu as pltpu

_EPS = 1e-8       # matches torch.nn.CosineSimilarity default eps
_ROW_ALIGN = 16   # sublane-safe row multiple for f32 (8) and bf16 (16) packing


def _cdiv(a, b):
    return -(-a // b)


def _vmem_budget():
    """(streamed-input byte budget, vmem_limit_bytes) sized per generation."""
    try:
        cap = pltpu.get_tpu_info().vmem_capacity_bytes
        if cap is not None and cap >= 100 * 1024 * 1024:      # v5e / v6e: 128 MiB
            return 24 * 1024 * 1024, 64 * 1024 * 1024
    except Exception:
        pass
    return 8 * 1024 * 1024, 32 * 1024 * 1024                  # v7x-safe default


def _choose_tile_rows(rows, d, itemsize, budget, min_tiles=2):
    # 2 inputs x 2 pipeline buffers of (tile_rows, d) must fit the budget.
    cap = budget // (4 * d * itemsize)
    cap = max(_ROW_ALIGN, min(8192, (cap // _ROW_ALIGN) * _ROW_ALIGN))
    # Aim for >= min_tiles row tiles so the leading split axis has work for
    # both TensorCores on v7x.
    if rows > min_tiles * _ROW_ALIGN:
        cap = min(cap, max(_ROW_ALIGN,
                           (_cdiv(rows, min_tiles) // _ROW_ALIGN) * _ROW_ALIGN))
    num_tiles = _cdiv(rows, cap)
    balanced = max(_ROW_ALIGN, _cdiv(_cdiv(rows, num_tiles), _ROW_ALIGN) * _ROW_ALIGN)
    # Prefer a tile that divides rows exactly (no mask path at all), as long
    # as it is not much smaller than the balanced ragged tile.
    t = min(cap, _cdiv(rows, _ROW_ALIGN) * _ROW_ALIGN)
    lo = max(_ROW_ALIGN, balanced // 2)
    while t >= lo:
        if rows % t == 0:
            return t
        t -= _ROW_ALIGN
    return balanced


def _cos_pair_kernel(f1_ref, f2_ref, out_ref, acc_ref, *,
                     one_minus_threshold, total_rows, inv_rows,
                     tile_rows, tiles_per_split, num_tiles, needs_mask):
    """Grid = (split, row_tile).

    Blocks:
      f1_ref / f2_ref : (tile_rows, D)  one row-tile (native dtype)
      out_ref         : (1, 8, 128)     lane-dense per-split partial result
      acc_ref         : (1, 1) f32      running sum of clipped terms (VMEM)
    """
    s = pl.program_id(0)   # split index ("parallel": megacore-shardable)
    t = pl.program_id(1)   # row-tile index within the split (reduction axis)

    @pl.when(t == 0)
    def _init():
        acc_ref[...] = jnp.zeros_like(acc_ref)

    f1 = f1_ref[...].astype(jnp.float32)                       # (tile_rows, D)
    f2 = f2_ref[...].astype(jnp.float32)

    # Per-row cosine similarity along the lane (feature) axis.
    dot = jnp.sum(f1 * f2, axis=-1, keepdims=True)             # (tile_rows, 1)
    n1 = jnp.sum(f1 * f1, axis=-1, keepdims=True)
    n2 = jnp.sum(f2 * f2, axis=-1, keepdims=True)
    # PyTorch clamps each norm separately: dot / (max(|f1|,eps) * max(|f2|,eps)).
    # rsqrt(max(n, eps^2)) == 1 / max(sqrt(n), eps) and lands on the EUP slot.
    inv12 = (lax.rsqrt(jnp.maximum(n1, _EPS * _EPS)) *
             lax.rsqrt(jnp.maximum(n2, _EPS * _EPS)))
    # Constant-folded epilogue: max((1 - thr) - cos, 0).
    term = jnp.maximum(one_minus_threshold - dot * inv12, 0.0)  # (tile_rows, 1)

    if needs_mask:  # static flag; mask work only runs on the edge/phantom tile
        is_edge = (s * tiles_per_split + t) >= (num_tiles - 1)

        @pl.when(jnp.logical_not(is_edge))
        def _acc_full():
            acc_ref[...] += jnp.sum(term, axis=0, keepdims=True)

        @pl.when(is_edge)
        def _acc_masked():
            g = s * tiles_per_split + t   # unclamped global tile index
            row = g * tile_rows + lax.broadcasted_iota(jnp.int32, term.shape, 0)
            # Garbage rows of the partial edge block may be NaN/Inf; the
            # select writes a literal 0.0 so nothing leaks into the sum.
            masked = jnp.where(row < total_rows, term, 0.0)
            acc_ref[...] += jnp.sum(masked, axis=0, keepdims=True)
    else:
        acc_ref[...] += jnp.sum(term, axis=0, keepdims=True)

    @pl.when(t == tiles_per_split - 1)
    def _final():
        out_ref[...] = jnp.broadcast_to(acc_ref[...] * inv_rows, out_ref.shape)


def _pair_cos_loss(f1, f2, threshold, *, tile_rows=None, num_splits=None):
    """mean(clip(1 - cos(f1, f2, dim=-1) - threshold, min=0)) for one pair,
    as a single pallas_call (no host-side stack/pad copies)."""
    if tuple(f1.shape) != tuple(f2.shape):
        raise ValueError(f"shape mismatch: {f1.shape} vs {f2.shape}")
    d = f1.shape[-1]
    rows = int(math.prod(f1.shape[:-1])) if f1.ndim > 1 else 1
    f1r = f1.reshape(rows, d)   # reshape of leading dims: no HBM copy
    f2r = f2.reshape(rows, d)

    budget, vmem_limit = _vmem_budget()
    itemsize = max(jnp.dtype(f1.dtype).itemsize, jnp.dtype(f2.dtype).itemsize)
    if tile_rows is None:
        tile_rows = _choose_tile_rows(rows, d, itemsize, budget)
    else:
        tile_rows = max(_ROW_ALIGN, _cdiv(int(tile_rows), _ROW_ALIGN) * _ROW_ALIGN)

    num_tiles = _cdiv(rows, tile_rows)
    if num_splits is None:
        num_splits = 2 if num_tiles >= 2 else 1
    num_splits = max(1, min(int(num_splits), num_tiles))
    tiles_per_split = _cdiv(num_tiles, num_splits)
    # Mask needed if the last real tile is ragged or the split grid has a
    # phantom trailing step (odd tile count).
    needs_mask = (rows % tile_rows != 0) or (num_splits * tiles_per_split != num_tiles)

    kernel = functools.partial(
        _cos_pair_kernel,
        one_minus_threshold=1.0 - float(threshold),  # static; traced thresholds unsupported
        total_rows=rows,
        inv_rows=1.0 / rows,
        tile_rows=tile_rows,
        tiles_per_split=tiles_per_split,
        num_tiles=num_tiles,
        needs_mask=needs_mask,
    )

    def in_map(s, t):
        # Clamp phantom steps onto the previous block index so Pallas revisits
        # the already-resident buffer (no extra DMA); the in-kernel row mask
        # (computed from the UNclamped index) zeroes their contribution.
        return (jnp.minimum(s * tiles_per_split + t, num_tiles - 1), 0)

    out = pl.pallas_call(
        kernel,
        out_shape=jax.ShapeDtypeStruct((num_splits, 8, 128), jnp.float32),
        grid_spec=pltpu.PrefetchScalarGridSpec(
            num_scalar_prefetch=0,
            grid=(num_splits, tiles_per_split),
            in_specs=[
                pl.BlockSpec((tile_rows, d), in_map),
                pl.BlockSpec((tile_rows, d), in_map),
            ],
            out_specs=pl.BlockSpec((1, 8, 128), lambda s, t: (s, 0, 0)),
            scratch_shapes=[pltpu.VMEM((1, 1), jnp.float32)],
        ),
        compiler_params=pltpu.CompilerParams(
            # Split axis is independent (megacore-shardable on v7x); the
            # row-tile axis carries the resident accumulator -> arbitrary.
            dimension_semantics=("parallel", "arbitrary"),
            vmem_limit_bytes=vmem_limit,
        ),
        cost_estimate=pl.CostEstimate(
            flops=6 * rows * d,
            transcendentals=2 * rows,
            bytes_accessed=rows * d * (jnp.dtype(f1.dtype).itemsize
                                       + jnp.dtype(f2.dtype).itemsize)
                           + num_splits * 8 * 128 * 4,
        ),
    )(f1r, f2r)
    return jnp.sum(out[:, 0, 0])   # sum the per-split partial means


class CosinConsistentLoss:
    """JAX/Pallas port of the PyTorch CosinConsistentLoss module."""

    def __init__(self, weight, threshold=0.0, return_type="sum"):
        # `weight` is stored but not applied in forward (matches the PyTorch
        # module, which only keeps it for the surrounding framework).
        self.weight = weight
        self.threshold = threshold
        self.return_type = return_type

    def __call__(self, input):
        if input["mems_anomal"] is None:
            return 0
        f1_list = list(input["mems_input"]["memories_attn"])
        f2_list = list(input["mems_anomal"]["memories_attn"])
        losses = [_pair_cos_loss(f1, f2, self.threshold)
                  for f1, f2 in zip(f1_list, f2_list)]
        total = losses[0]
        for l in losses[1:]:
            total = total + l
        if self.return_type == "sum":
            return total
        return total / len(losses)


def _reference_loss(input, threshold, return_type):
    """Pure-JAX reference (PyTorch eps semantics) for sanity checking."""
    if input["mems_anomal"] is None:
        return 0
    losses = []
    for f1, f2 in zip(
        input["mems_input"]["memories_attn"], input["mems_anomal"]["memories_attn"]
    ):
        f1 = f1.astype(jnp.float32)
        f2 = f2.astype(jnp.float32)
        dot = jnp.sum(f1 * f2, axis=-1)
        n1 = jnp.maximum(jnp.sqrt(jnp.sum(f1 * f1, axis=-1)), _EPS)
        n2 = jnp.maximum(jnp.sqrt(jnp.sum(f2 * f2, axis=-1)), _EPS)
        cos = dot / (n1 * n2)
        losses.append(jnp.mean(jnp.maximum(1.0 - cos - threshold, 0.0)))
    total = sum(losses)
    return total if return_type == "sum" else total / len(losses)


if __name__ == "__main__":
    key = jax.random.PRNGKey(0)

    # Test 1: 3 layers of (B=2, N=16, D=128) f32, return_type='sum'.
    num_layers, B, N, D = 3, 2, 16, 128
    keys = jax.random.split(key, 2 * num_layers)
    mems_input = {
        "memories_attn": [
            jax.random.normal(keys[i], (B, N, D), dtype=jnp.float32)
            for i in range(num_layers)
        ]
    }
    mems_anomal = {
        "memories_attn": [
            jax.random.normal(keys[num_layers + i], (B, N, D), dtype=jnp.float32)
            for i in range(num_layers)
        ]
    }
    inputs = {"mems_input": mems_input, "mems_anomal": mems_anomal}

    loss_sum = CosinConsistentLoss(weight=1.0, threshold=0.0, return_type="sum")
    out_sum = jax.block_until_ready(loss_sum(inputs))
    ref_sum = _reference_loss(inputs, threshold=0.0, return_type="sum")
    assert jnp.allclose(out_sum, ref_sum, rtol=1e-5, atol=1e-5), (out_sum, ref_sum)

    # Test 2: same inputs, return_type='mean', nonzero threshold.
    loss_mean = CosinConsistentLoss(weight=1.0, threshold=0.1, return_type="mean")
    out_mean = jax.block_until_ready(loss_mean(inputs))
    ref_mean = _reference_loss(inputs, threshold=0.1, return_type="mean")
    assert jnp.allclose(out_mean, ref_mean, rtol=1e-5, atol=1e-5), (out_mean, ref_mean)

    # Test 3: bf16 inputs, rows (2*13=26) not divisible by a forced 16-row
    # tile -> exercises the 2-way split, ragged edge block (no host pad) and
    # the in-kernel row mask with native-dtype streaming.
    kb = jax.random.split(jax.random.PRNGKey(1), 4)
    g1 = [jax.random.normal(kb[i], (2, 13, 128), dtype=jnp.bfloat16) for i in range(2)]
    g2 = [jax.random.normal(kb[2 + i], (2, 13, 128), dtype=jnp.bfloat16) for i in range(2)]
    per_pair = jax.block_until_ready(
        jnp.stack([_pair_cos_loss(a, b, threshold=0.0, tile_rows=16)
                   for a, b in zip(g1, g2)])
    )
    ref_pp = jnp.stack(
        [
            _reference_loss(
                {"mems_input": {"memories_attn": [a]},
                 "mems_anomal": {"memories_attn": [b]}},
                threshold=0.0,
                return_type="sum",
            )
            for a, b in zip(g1, g2)
        ]
    )
    assert jnp.allclose(per_pair, ref_pp, rtol=1e-3, atol=1e-3), (per_pair, ref_pp)

    # Test 4: f32 (3,16,128) -> rows=48 with forced 16-row tile gives an ODD
    # tile count (3): exercises the phantom (clamped/revisited) grid step of
    # the 2-way split.
    kc = jax.random.split(jax.random.PRNGKey(2), 2)
    h1 = jax.random.normal(kc[0], (3, 16, 128), dtype=jnp.float32)
    h2 = jax.random.normal(kc[1], (3, 16, 128), dtype=jnp.float32)
    out_odd = jax.block_until_ready(_pair_cos_loss(h1, h2, threshold=0.0, tile_rows=16))
    ref_odd = _reference_loss(
        {"mems_input": {"memories_attn": [h1]},
         "mems_anomal": {"memories_attn": [h2]}},
        threshold=0.0, return_type="sum")
    assert jnp.allclose(out_odd, ref_odd, rtol=1e-5, atol=1e-5), (out_odd, ref_odd)

    # Test 5: None branch (returns 0, no kernel launch).
    assert loss_sum({"mems_input": mems_input, "mems_anomal": None}) == 0

    print("KERNEL_OK")
</pallas_src>

<mosaic_0001>
module attributes {stable_mosaic.version = 11 : i64} {
  func.func @_cos_pair_kernel(%arg0: i32, %arg1: i32, %arg2: memref<32x128xf32, #tpu.memory_space<vmem>>, %arg3: memref<32x128xf32, #tpu.memory_space<vmem>>, %arg4: memref<1x8x128xf32, #tpu.memory_space<vmem>>, %arg5: memref<1x1xf32, #tpu.memory_space<vmem>>) attributes {dimension_semantics = [#tpu.dimension_semantics<parallel>, #tpu.dimension_semantics<arbitrary>], iteration_bounds = array<i64: 1, 1>, scalar_prefetch = 0 : i64, scratch_operands = 1 : i64, tpu.core_type = #tpu.core_type<tc>, window_params = [{transform_indices = @transform_0, window_bounds = array<i64: 32, 128>}, {transform_indices = @transform_1, window_bounds = array<i64: 32, 128>}, {transform_indices = @transform_2, window_bounds = array<i64: 1, 8, 128>}]} {
    %c0_i32 = arith.constant 0 : i32
    %0 = arith.cmpi eq, %arg1, %c0_i32 : i32
    %1 = arith.extui %0 : i1 to i32
    %c0_i32_0 = arith.constant 0 : i32
    %2 = arith.cmpi ne, %1, %c0_i32_0 : i32
    scf.if %2 {
      %cst_17 = arith.constant 0.000000e+00 : f32
      %34 = vector.broadcast %cst_17 : f32 to vector<1x1xf32>
      %c0_18 = arith.constant 0 : index
      %c0_19 = arith.constant 0 : index
      %35 = vector.load %arg5[%c0_18, %c0_19] : memref<1x1xf32, #tpu.memory_space<vmem>>, vector<1x1xf32>
      tpu.vector_store %arg5[%c0_18, %c0_19], %34 {strides = array<i32>} : memref<1x1xf32, #tpu.memory_space<vmem>>, vector<1x1xf32>,
    } else {
    }
    %c0 = arith.constant 0 : index
    %c0_1 = arith.constant 0 : index
    %3 = vector.load %arg2[%c0, %c0_1] : memref<32x128xf32, #tpu.memory_space<vmem>>, vector<32x128xf32>
    %c0_2 = arith.constant 0 : index
    %c0_3 = arith.constant 0 : index
    %4 = vector.load %arg3[%c0_2, %c0_3] : memref<32x128xf32, #tpu.memory_space<vmem>>, vector<32x128xf32>
    %5 = arith.mulf %3, %4 : vector<32x128xf32>
    %cst = arith.constant dense<0.000000e+00> : vector<32xf32>
    %6 = vector.multi_reduction <add>, %5, %cst [1] : vector<32x128xf32> to vector<32xf32>
    %7 = vector.shape_cast %6 : vector<32xf32> to vector<32x1xf32>
    %8 = arith.mulf %3, %3 : vector<32x128xf32>
    %cst_4 = arith.constant dense<0.000000e+00> : vector<32xf32>
    %9 = vector.multi_reduction <add>, %8, %cst_4 [1] : vector<32x128xf32> to vector<32xf32>
    %10 = vector.shape_cast %9 : vector<32xf32> to vector<32x1xf32>
    %11 = arith.mulf %4, %4 : vector<32x128xf32>
    %cst_5 = arith.constant dense<0.000000e+00> : vector<32xf32>
    %12 = vector.multi_reduction <add>, %11, %cst_5 [1] : vector<32x128xf32> to vector<32xf32>
    %13 = vector.shape_cast %12 : vector<32xf32> to vector<32x1xf32>
    %cst_6 = arith.constant 1.000000e-16 : f32
    %14 = vector.broadcast %cst_6 : f32 to vector<32x1xf32>
    %15 = arith.maximumf %10, %14 : vector<32x1xf32>
    %16 = math.rsqrt %15 : vector<32x1xf32>
    %cst_7 = arith.constant 1.000000e-16 : f32
    %17 = vector.broadcast %cst_7 : f32 to vector<32x1xf32>
    %18 = arith.maximumf %13, %17 : vector<32x1xf32>
    %19 = math.rsqrt %18 : vector<32x1xf32>
    %20 = arith.mulf %16, %19 : vector<32x1xf32>
    %21 = arith.mulf %7, %20 : vector<32x1xf32>
    %cst_8 = arith.constant 1.000000e+00 : f32
    %22 = vector.broadcast %cst_8 : f32 to vector<32x1xf32>
    %23 = arith.subf %22, %21 : vector<32x1xf32>
    %cst_9 = arith.constant 0.000000e+00 : f32
    %24 = vector.broadcast %cst_9 : f32 to vector<32x1xf32>
    %25 = arith.maximumf %23, %24 : vector<32x1xf32>
    %c0_10 = arith.constant 0 : index
    %c0_11 = arith.constant 0 : index
    %26 = vector.load %arg5[%c0_10, %c0_11] : memref<1x1xf32, #tpu.memory_space<vmem>>, vector<1x1xf32>
    %cst_12 = arith.constant dense<0.000000e+00> : vector<1xf32>
    %27 = vector.multi_reduction <add>, %25, %cst_12 [0] : vector<32x1xf32> to vector<1xf32>
    %28 = vector.shape_cast %27 : vector<1xf32> to vector<1x1xf32>
    %29 = arith.addf %26, %28 : vector<1x1xf32>
    %c0_13 = arith.constant 0 : index
    %c0_14 = arith.constant 0 : index
    %30 = vector.load %arg5[%c0_13, %c0_14] : memref<1x1xf32, #tpu.memory_space<vmem>>, vector<1x1xf32>
    tpu.vector_store %arg5[%c0_13, %c0_14], %29 {strides = array<i32>} : memref<1x1xf32, #tpu.memory_space<vmem>>, vector<1x1xf32>,
    %c0_i32_15 = arith.constant 0 : i32
    %31 = arith.cmpi eq, %arg1, %c0_i32_15 : i32
    %32 = arith.extui %31 : i1 to i32
    %c0_i32_16 = arith.constant 0 : i32
    %33 = arith.cmpi ne, %32, %c0_i32_16 : i32
    scf.if %33 {
      %c0_17 = arith.constant 0 : index
      %c0_18 = arith.constant 0 : index
      %34 = vector.load %arg5[%c0_17, %c0_18] : memref<1x1xf32, #tpu.memory_space<vmem>>, vector<1x1xf32>
      %cst_19 = arith.constant 3.125000e-02 : f32
      %35 = vector.broadcast %cst_19 : f32 to vector<1x1xf32>
      %36 = arith.mulf %34, %35 : vector<1x1xf32>
      %37 = vector.shape_cast %36 : vector<1x1xf32> to vector<1x1x1xf32>
      %38 = vector.broadcast %37 : vector<1x1x1xf32> to vector<1x8x128xf32>
      %c0_20 = arith.constant 0 : index
      %c0_21 = arith.constant 0 : index
      %c0_22 = arith.constant 0 : index
      %39 = vector.load %arg4[%c0_20, %c0_21, %c0_22] : memref<1x8x128xf32, #tpu.memory_space<vmem>>, vector<1x8x128xf32>
      tpu.vector_store %arg4[%c0_20, %c0_21, %c0_22], %38 {strides = array<i32>} : memref<1x8x128xf32, #tpu.memory_space<vmem>>, vector<1x8x128xf32>,
    } else {
    }
    return
  }
  func.func @transform_0(%arg0: i32, %arg1: i32) -> (i32, i32) {
    %c1_i32 = arith.constant 1 : i32
    %0 = arith.muli %arg0, %c1_i32 : i32
    %1 = arith.addi %0, %arg1 : i32
    %c0_i32 = arith.constant 0 : i32
    %2 = arith.minsi %1, %c0_i32 : i32
    %c0_i32_0 = arith.constant 0 : i32
    %c0_i32_1 = arith.constant 0 : i32
    return %2, %c0_i32_0 : i32, i32
  }
  func.func @transform_1(%arg0: i32, %arg1: i32) -> (i32, i32) {
    %c1_i32 = arith.constant 1 : i32
    %0 = arith.muli %arg0, %c1_i32 : i32
    %1 = arith.addi %0, %arg1 : i32
    %c0_i32 = arith.constant 0 : i32
    %2 = arith.minsi %1, %c0_i32 : i32
    %c0_i32_0 = arith.constant 0 : i32
    %c0_i32_1 = arith.constant 0 : i32
    return %2, %c0_i32_0 : i32, i32
  }
  func.func @transform_2(%arg0: i32, %arg1: i32) -> (i32, i32, i32) {
    %c0_i32 = arith.constant 0 : i32
    %c0_i32_0 = arith.constant 0 : i32
    %c0_i32_1 = arith.constant 0 : i32
    return %arg0, %c0_i32, %c0_i32_0 : i32, i32, i32
  }
}

</mosaic_0001>

<bundles_post_ra>
// kernel: tpu_custom_call.1
= control target key start
LH: loop header
LB: loop body
LE: loop exit
PB: predicated region body
PF: predicated region fallthrough
CT: control target
= control target key end

     0   :  { %7 = vsyncpa [#allocation4], 0  ;;  %s346_s0 = inlined_call_operand.hbm [shape: f32[32,128], index: 0, kind: input, shape index: {}]   ;;  %s347_s1 = inlined_call_operand.hbm [shape: f32[32,128], index: 1, kind: input, shape index: {}]   ;;  %s348_s2 = inlined_call_operand.hbm [shape: f32[1,8,128], index: 2, kind: output, shape index: {}]  }
   0x1   :  { %8 = vsyncpa [#allocation7], 0 }
   0x2   :  { %9 = vsyncpa [#allocation5], 0  ;;  %s286_s9 = smov [#allocation3]   ;;  %s214_s13 = scalar_lea.hbm %s346_s0, 512 }
   0x3   :  { %s21_s10 = sshll.u32 %s286_s9, 4  ;;  %p215_p0 = scmp.ne.s32.totalorder %s346_s0, %s214_s13  ;;  %s22_s10 = int_to_ptr.vmem [resolvable:$true] %s21_s10 }
   0x4   :  { %p218_p1 = scmp.lt.u32.totalorder %s214_s13, %s346_s0 }
   0x6   :  { %p220_p2 = pnand %p218_p1, %p215_p0 }
   0x8   :  { %223 = shalt.err (!%p220_p2)
}
   0x9   :  { %s224_s18 = scalar_lea.vmem %s22_s10, 512  ;;  %p229_p4 = scmp.lt.s32.totalorder %s22_s10, %s22_s10 }
   0xa   :  { %p225_p3 = scmp.ne.s32.totalorder %s22_s10, %s224_s18  ;;  %p230_p5 = scmp.lt.s32.totalorder %s224_s18, %s224_s18 }
   0xc   :  { %p231_p6 = por %p230_p5, %p229_p4 }
   0xe   :  { %p232_p7 = pnand %p231_p6, %p225_p3 }
  0x10   :  { %235 = shalt.err (!%p232_p7)
}
  0x11   :  { %s287_s19 = smov 128   ;;  %s288_s20 = smov 8  }
  0x12   :  { %27 = dma.hbm_to_vmem [thread:$0]  %s346_s0, 512, %s22_s10, [#allocation4], %s287_s19, %s287_s19, %s288_s20  }
  0x13   :  { %s289_s23 = smov [#allocation6]   ;;  %s236_s27 = scalar_lea.hbm %s347_s1, 512 }
  0x14   :  { %s39_s24 = sshll.u32 %s289_s23, 4  ;;  %p237_p8 = scmp.ne.s32.totalorder %s347_s1, %s236_s27  ;;  %s40_s24 = int_to_ptr.vmem [resolvable:$true] %s39_s24 }
  0x15   :  { %p240_p9 = scmp.lt.u32.totalorder %s236_s27, %s347_s1 }
  0x17   :  { %p242_p10 = pnand %p240_p9, %p237_p8 }
  0x19   :  { %245 = shalt.err (!%p242_p10)
}
  0x1a   :  { %s246_s4 = scalar_lea.vmem %s40_s24, 512  ;;  %p251_p12 = scmp.lt.s32.totalorder %s40_s24, %s40_s24 }
  0x1b   :  { %p247_p11 = scmp.ne.s32.totalorder %s40_s24, %s246_s4  ;;  %p252_p13 = scmp.lt.s32.totalorder %s246_s4, %s246_s4 }
  0x1d   :  { %p253_p0 = por %p252_p13, %p251_p12 }
  0x1f   :  { %p254_p1 = pnand %p253_p0, %p247_p11 }
  0x21   :  { %257 = shalt.err (!%p254_p1)
}
  0x22   :  { %45 = dma.hbm_to_vmem [thread:$0]  %s347_s1, 512, %s40_s24, [#allocation7], %s287_s19, %s287_s19, %s288_s20  }
  0x23   :  { %280 = dma.done.wait [#allocation4], 512  }
  0x24   :  { %281 = vsyncadd [#allocation4], 4294966784 }
  0x25   :  { %282 = dma.done.wait [#allocation7], 512  }
  0x26   :  { %283 = vsyncadd [#allocation7], 4294966784  ;;  %v70_v0 = vld [vmem:[#allocation6] sm:$0xff]  ;;  %v71_v2 = vld [vmem:[#allocation6 + $0x8] sm:$0xff]  ;;  %vm64_vm0 = vcmask 0   ;;  %v290_v20 = vmov 0.0  }
  0x27   :  { %v66_v1 = vld [vmem:[#allocation3] sm:$0xff]  ;;  %v98_v3 = vmul.f32 %v70_v0, %v70_v0  ;;  %v67_v5 = vld [vmem:[#allocation3 + $0x8] sm:$0xff]  ;;  %v99_v6 = vmul.f32 %v71_v2, %v71_v2  ;;  %v72_v8 = vld [vmem:[#allocation6 + $0x10] sm:$0xff]  ;;  %65 = vst.msk [vmem:[#allocation2] sm:$0x1] %vm64_vm0, %v290_v20  ;;  %v291_v21 = vmov 0  }
  0x28   :  { %v86_v4 = vmul.f32 %v66_v1, %v66_v1  ;;  %v87_v7 = vmul.f32 %v67_v5, %v67_v5  ;;  %v68_v9 = vld [vmem:[#allocation3 + $0x10] sm:$0xff]  ;;  %v100_v10 = vmul.f32 %v72_v8, %v72_v8  ;;  %v73_v12 = vld [vmem:[#allocation6 + $0x18] sm:$0xff]  ;;  %v74_v16 = vmul.f32 %v70_v0, %v66_v1  ;;  %197 = vset.pattern.permute.xlu0 %v291_v21  ;;  %s292_s1 = smov [#allocation8]  }
  0x29   :  { %102 = vadd.xlane.f32.xlu1 %v98_v3  ;;  %v88_v11 = vmul.f32 %v68_v9, %v68_v9  ;;  %v69_v13 = vld [vmem:[#allocation3 + $0x18] sm:$0xff]  ;;  %v101_v14 = vmul.f32 %v73_v12, %v73_v12  ;;  %v75_v17 = vmul.f32 %v71_v2, %v67_v5  ;;  %v76_v18 = vmul.f32 %v72_v8, %v68_v9  ;;  %s176_s6 = sshll.u32 %s292_s1, 4  ;;  %s177_s6 = int_to_ptr.vmem [resolvable:$true] %s176_s6 }
  0x2a   :  { %90 = vadd.xlane.f32.xlu0 %v86_v4  ;;  %v89_v15 = vmul.f32 %v69_v13, %v69_v13  ;;  %v77_v19 = vmul.f32 %v73_v12, %v69_v13  ;;  %v161_v13 = vlaneseq  ;;  %s258_s7 = scalar_lea.vmem %s177_s6, 128  ;;  %p263_p3 = scmp.lt.s32.totalorder %s177_s6, %s177_s6 }
  0x2b   :  { %p259_p2 = scmp.ne.s32.totalorder %s177_s6, %s258_s7  ;;  %p264_p4 = scmp.lt.s32.totalorder %s258_s7, %s258_s7 }
  0x2d   :  { %104 = vadd.xlane.f32.xlu1 %v99_v6  ;;  %p265_p5 = por %p264_p4, %p263_p3 }
  0x2e   :  { %92 = vadd.xlane.f32.xlu0 %v87_v7 }
  0x2f   :  { %p266_p6 = pnand %p265_p5, %p259_p2 }
  0x31   :  { %106 = vadd.xlane.f32.xlu1 %v100_v10  ;;  %v142_v10 = vld [vmem:[#allocation2] sm:$0x1] }
  0x32   :  { %94 = vadd.xlane.f32.xlu0 %v88_v11 }
  0x35   :  { %108 = vadd.xlane.f32.xlu1 %v101_v14  ;;  %v162_v14 = vshrl.u32 %v161_v13, 7 }
  0x36   :  { %96 = vadd.xlane.f32.xlu0 %v89_v15 }
  0x37   :  { %v163_v15 = vsub.s32 0, %v162_v14 }
  0x39   :  { %80 = vadd.xlane.f32.xlu1 %v75_v17 }
  0x3a   :  { %78 = vadd.xlane.f32.xlu0 %v74_v16 }
  0x3d   :  { %84 = vadd.xlane.f32.xlu1 %v77_v19 }
  0x3e   :  { %82 = vadd.xlane.f32.xlu0 %v76_v18 }
  0xb6   :  { %v103_v22 = vpop.xlane.xlu1 %102 }
  0xb7   :  { %v91_v23 = vpop.xlane.xlu0 %90  ;;  %v118_v24 = vmax.f32 %v103_v22, 1e-16 }
  0xb8   :  { %v110_v25 = vmax.f32 %v91_v23, 1e-16 }
  0xb9   :  { %198 = vrsqrt.f32 %v118_v24 }
  0xba   :  { %200 = vrsqrt.f32 %v110_v25  ;;  %v105_v26 = vpop.xlane.xlu1 %104 }
  0xbb   :  { %v93_v27 = vpop.xlane.xlu0 %92  ;;  %v119_v28 = vmax.f32 %v105_v26, 1e-16 }
  0xbc   :  { %v111_v29 = vmax.f32 %v93_v27, 1e-16 }
  0xbd   :  { %202 = vrsqrt.f32 %v119_v28 }
  0xbe   :  { %204 = vrsqrt.f32 %v111_v29  ;;  %v107_v30 = vpop.xlane.xlu1 %106 }
  0xbf   :  { %v95_v31 = vpop.xlane.xlu0 %94  ;;  %v120_v32 = vmax.f32 %v107_v30, 1e-16 }
  0xc0   :  { %v112_v33 = vmax.f32 %v95_v31, 1e-16 }
  0xc1   :  { %206 = vrsqrt.f32 %v120_v32 }
  0xc2   :  { %208 = vrsqrt.f32 %v112_v33  ;;  %v109_v34 = vpop.xlane.xlu1 %108 }
  0xc3   :  { %v97_v35 = vpop.xlane.xlu0 %96  ;;  %v199_v36 = vpop.eup %198  ;;  %v121_v37 = vmax.f32 %v109_v34, 1e-16 }
  0xc4   :  { %v113_v38 = vmax.f32 %v97_v35, 1e-16  ;;  %v201_v39 = vpop.eup %200 }
  0xc5   :  { %210 = vrsqrt.f32 %v121_v37  ;;  %v126_v41 = vmul.f32 %v201_v39, %v199_v36 }
  0xc6   :  { %212 = vrsqrt.f32 %v113_v38  ;;  %v81_v44 = vpop.xlane.xlu1 %80 }
  0xc7   :  { %v203_v40 = vpop.eup %202  ;;  %v79_v43 = vpop.xlane.xlu0 %78 }
  0xc8   :  { %v205_v42 = vpop.eup %204  ;;  %v130_v47 = vmul.f32 %v126_v41, %v79_v43 }
  0xc9   :  { %v127_v45 = vmul.f32 %v205_v42, %v203_v40 }
  0xca   :  { %v134_v54 = vsub.f32 1.0, %v130_v47  ;;  %v85_v57 = vpop.xlane.xlu1 %84 }
  0xcb   :  { %v207_v46 = vpop.eup %206  ;;  %v131_v48 = vmul.f32 %v127_v45, %v81_v44  ;;  %v83_v50 = vpop.xlane.xlu0 %82 }
  0xcc   :  { %v209_v49 = vpop.eup %208  ;;  %v138_v61 = vmax.f32 %v134_v54, 0.0 }
  0xcd   :  { %v135_v51 = vsub.f32 1.0, %v131_v48  ;;  %v128_v52 = vmul.f32 %v209_v49, %v207_v46 }
  0xcf   :  { %v211_v53 = vpop.eup %210  ;;  %v132_v55 = vmul.f32 %v128_v52, %v83_v50  ;;  %v139_v58 = vmax.f32 %v135_v51, 0.0 }
  0xd0   :  { %v213_v56 = vpop.eup %212 }
  0xd1   :  { %v136_v59 = vsub.f32 1.0, %v132_v55  ;;  %v129_v60 = vmul.f32 %v213_v56, %v211_v53  ;;  %v143_v0 = vadd.f32 %v139_v58, %v138_v61 }
  0xd3   :  { %v140_v62 = vmax.f32 %v136_v59, 0.0  ;;  %v133_v63 = vmul.f32 %v129_v60, %v85_v57 }
  0xd5   :  { %v137_v1 = vsub.f32 1.0, %v133_v63  ;;  %v144_v2 = vadd.f32 %v143_v0, %v140_v62 }
  0xd7   :  { %v141_v3 = vmax.f32 %v137_v1, 0.0 }
  0xd9   :  { %v145_v4 = vadd.f32 %v144_v2, %v141_v3 }
  0xdb   :  { %v146_v5 = vrot.slane %v145_v4, 4 }
  0xdd   :  { %v147_v6 = vadd.f32 %v146_v5, %v145_v4 }
  0xdf   :  { %v148_v7 = vrot.slane %v147_v6, 2 }
  0xe1   :  { %v149_v8 = vadd.f32 %v148_v7, %v147_v6 }
  0xe3   :  { %v150_v9 = vrot.slane %v149_v8, 1 }
  0xe5   :  { %v151_v11 = vadd.f32 %v150_v9, %v149_v8 }
  0xe7   :  { %v152_v12 = vadd.f32 %v151_v11, %v142_v10 }
  0xe9   :  { %154 = vst.msk [vmem:[#allocation2] sm:$0x1] %vm64_vm0, %v152_v12 }
  0xf0   :  { %v158_v16 = vld [vmem:[#allocation2] sm:$0x1] }
  0xf1   :  { %v159_v17 = vmul.f32 0.03125, %v158_v16 }
  0xf3   :  { %v164_v18 = vrot.slane %v159_v17, %v163_v15 }
  0xf5   :  { %166 = vperm.xlu0 %197, %v164_v18  }
 0x174   :  { %v167_v19 = vpop.permute.xlu0 %166 }
 0x175   :  { %169 = vst [vmem:[#allocation8] sm:$0xff] %v167_v19 }
 0x176   :  { %269 = shalt.err (!%p266_p6)
}
 0x177   :  { %s270_s10 = scalar_lea.hbm %s348_s2, 128 }
 0x178   :  { %p271_p7 = scmp.ne.s32.totalorder %s348_s2, %s270_s10  ;;  %p274_p8 = scmp.lt.u32.totalorder %s270_s10, %s348_s2 }
 0x17a   :  { %p276_p9 = pnand %p274_p8, %p271_p7 }
 0x17c   :  { %279 = shalt.err (!%p276_p9)
}
 0x17d   :  { %179 = dma.vmem_to_hbm [thread:$0]  %s177_s6, 128, %s348_s2, [#allocation5]  }
 0x17e   :  { %284 = dma.done.wait [#allocation5], 128  }
 0x17f   :  { %285 = vsyncadd [#allocation5], 4294967168 }
 0x180   :  { %183 = vsyncpa [#allocation4], 1 }
 0x181   :  { %184 = vsyncpa [#allocation7], 1 }
 0x182   :  { %185 = vsyncpa [#allocation5], 1 }

</bundles_post_ra>
